<compile_context>
chip_gen: v5e
topology: v5e:2x2
jax: 0.10.0
libtpu: 0.0.40
codegen_flags: <defaults>
</compile_context>

<pallas_src>
import math
import functools

import jax
import jax.numpy as jnp
from jax import lax
from jax.experimental import pallas as pl
from jax.experimental.pallas import tpu as pltpu


_NEG_BIG = -1e30          # finite "-inf": avoids inf-inf NaNs with masking.
_SMALL_L = 512            # below this, a single full-extent tile is used as-is.


def _flash_attn_kernel(q_ref, k_ref, v_ref, o_ref, m_ref, l_ref, acc_ref, *,
                       c_exp2, length, needs_mask, exp_dtype):
    """One (batch*head, q-tile, kv-tile) step of online-softmax attention.

    q_ref: (ch, tq)   k_ref/v_ref: (ch, tkv)   o_ref: (ch, tq)
    m_ref/l_ref: (1, tq) f32      acc_ref: (ch, tq) f32   (all lane-dense)
    """
    ki = pl.program_id(2)

    @pl.when(ki == 0)
    def _init():
        m_ref[...] = jnp.full(m_ref.shape, _NEG_BIG, dtype=m_ref.dtype)
        l_ref[...] = jnp.zeros(l_ref.shape, dtype=l_ref.dtype)
        acc_ref[...] = jnp.zeros(acc_ref.shape, dtype=acc_ref.dtype)

    q = q_ref[...]                     # (ch, tq)  -- invariant across ki, no prep
    k = k_ref[...]                     # (ch, tkv)
    v = v_ref[...]                     # (ch, tkv)

    # s[u, t] = sum_c k[c, u] * q[c, t] -> (tkv, tq).  q is NOT pre-scaled; the
    # softmax scale is folded into the exp2 constant below (f32, single mul).
    s = lax.dot_general(k, q, (((0,), (0,)), ((), ())),
                        preferred_element_type=jnp.float32)

    if needs_mask:
        tkv = k.shape[1]
        key_idx = ki * tkv + lax.broadcasted_iota(jnp.int32, (tkv, 1), 0)
        s = jnp.where(key_idx < length, s, _NEG_BIG)

    m_prev = m_ref[...]                                            # (1, tq)
    m_new = jnp.maximum(m_prev, jnp.max(s, axis=0, keepdims=True))
    alpha = jnp.exp2((m_prev - m_new) * c_exp2)                    # (1, tq)

    x = (s - m_new) * c_exp2                                       # f32
    if jnp.dtype(exp_dtype) != jnp.dtype(jnp.float32):
        x = x.astype(exp_dtype)        # bf16 exp on v6e/v7x (2x EUP rate)
    p = jnp.exp2(x)                                                # (tkv, tq)

    l_ref[...] = alpha * l_ref[...] + jnp.sum(
        p.astype(jnp.float32), axis=0, keepdims=True)

    # pv[c, t] = sum_u v[c, u] * p[u, t] -> (ch, tq); canonical MXU orientation
    # (lhs contraction on lanes, rhs contraction on sublanes), no transposes.
    pv = lax.dot_general(v, p.astype(v.dtype), (((1,), (0,)), ((), ())),
                         preferred_element_type=jnp.float32)
    acc_ref[...] = alpha * acc_ref[...] + pv
    m_ref[...] = m_new

    @pl.when(ki == pl.num_programs(2) - 1)
    def _finalize():
        inv_l = pl.reciprocal(l_ref[...], approx=True)             # (1, tq), EUP
        # Lane-dense (ch, tq) store, no output transpose.
        o_ref[...] = (acc_ref[...] * inv_l).astype(o_ref.dtype)


def _choose_tiles(length, ch, itemsize, b_total):
    """Returns (l_pad, tq, tkv) under a conservative (v7x-safe) VMEM budget."""
    if length % 128 == 0:
        l_pad = length
    elif length <= _SMALL_L:
        # Single full-extent tile (both dims equal the full array extents).
        return length, length, length
    else:
        l_pad = ((length + 127) // 128) * 128    # pad + in-kernel key mask

    tq = next((t for t in (512, 256, 128) if l_pad % t == 0), l_pad)
    # Give both v7x TensorCores work when bs*heads is tiny (no-op on v5e/v6e).
    while b_total * (l_pad // tq) < 2 and tq > 128:
        tq //= 2

    budget = 18 * 1024 * 1024  # stays well under the 32 MiB scoped default

    def vmem_est(tq_, tkv_):
        blocks = 2 * itemsize * (ch * tq_ + 2 * ch * tkv_)   # double-buffered in
        blocks += 2 * itemsize * ch * tq_                    # double-buffered out
        scratch = 4 * (ch * tq_ + 2 * 8 * tq_)
        interm = 3 * 4 * tq_ * tkv_                          # s / p / temporaries
        return blocks + scratch + interm

    # Prefer resident K/V (kv grid axis of 1 -> K/V DMA'd once per batch*head).
    for tkv in (l_pad, 2048, 1024, 512, 256, 128):
        if tkv <= l_pad and l_pad % tkv == 0 and vmem_est(tq, tkv) <= budget:
            return l_pad, tq, tkv
    return l_pad, tq, 128


def qkv_attention_legacy(qkv, n_heads, *, tq=None, tkv=None,
                         exp_dtype=jnp.float32):
    """Pallas TPU implementation of QKVAttentionLegacy.forward.

    qkv: (bs, 3 * n_heads * ch, length)  ->  (bs, n_heads * ch, length)
    """
    bs, width, length = qkv.shape
    assert width % (3 * n_heads) == 0
    ch = width // (3 * n_heads)
    B = bs * n_heads
    itemsize = jnp.dtype(qkv.dtype).itemsize

    l_pad, tq_auto, tkv_auto = _choose_tiles(length, ch, itemsize, B)
    tq = tq or tq_auto
    tkv = tkv or tkv_auto
    assert l_pad % tq == 0 and l_pad % tkv == 0, (length, l_pad, tq, tkv)

    # Free row-major view: (bs, 3*nh*ch, L) -> (B, 3, ch, L).  q/k/v live at
    # index 0/1/2 along axis 1, so no host-side slice copies for any ch.
    qkv_r = qkv.reshape(B, 3, ch, length)
    if l_pad != length:
        qkv_r = jnp.pad(qkv_r, ((0, 0), (0, 0), (0, 0), (0, l_pad - length)))

    grid = (B, l_pad // tq, l_pad // tkv)
    # exp(x/sqrt(ch)) == exp2(x * log2(e)/sqrt(ch)): scale + log2e in one const.
    c_exp2 = math.log2(math.e) / math.sqrt(ch)

    kernel = functools.partial(
        _flash_attn_kernel, c_exp2=c_exp2, length=length,
        needs_mask=(l_pad != length), exp_dtype=exp_dtype)

    cost = pl.CostEstimate(
        flops=4 * B * length * length * ch,
        transcendentals=B * length * length,
        bytes_accessed=4 * B * ch * length * itemsize)

    out = pl.pallas_call(
        kernel,
        out_shape=jax.ShapeDtypeStruct((B, ch, l_pad), qkv.dtype),
        grid_spec=pltpu.PrefetchScalarGridSpec(
            num_scalar_prefetch=0,
            grid=grid,
            in_specs=[
                pl.BlockSpec((None, None, ch, tq),
                             lambda b, qi, ki: (b, 0, 0, qi)),     # Q
                pl.BlockSpec((None, None, ch, tkv),
                             lambda b, qi, ki: (b, 1, 0, ki)),     # K
                pl.BlockSpec((None, None, ch, tkv),
                             lambda b, qi, ki: (b, 2, 0, ki)),     # V
            ],
            out_specs=pl.BlockSpec((None, ch, tq),
                                   lambda b, qi, ki: (b, 0, qi)),
            scratch_shapes=[
                pltpu.VMEM((1, tq), jnp.float32),     # running max (lane-dense)
                pltpu.VMEM((1, tq), jnp.float32),     # running denom (lane-dense)
                pltpu.VMEM((ch, tq), jnp.float32),    # running numerator
            ],
        ),
        compiler_params=pltpu.CompilerParams(
            dimension_semantics=("parallel", "parallel", "arbitrary")),
        cost_estimate=cost,
    )(qkv_r, qkv_r, qkv_r)

    if l_pad != length:
        out = out[..., :length]
    return out.reshape(bs, n_heads * ch, length)


def _reference(qkv, n_heads):
    bs, width, length = qkv.shape
    ch = width // (3 * n_heads)
    qkv_r = qkv.reshape(bs * n_heads, 3 * ch, length)
    q, k, v = qkv_r[:, :ch], qkv_r[:, ch:2 * ch], qkv_r[:, 2 * ch:]
    scale = 1.0 / math.sqrt(math.sqrt(ch))
    w = jnp.einsum('bct,bcs->bts', q * scale, k * scale)
    w = jax.nn.softmax(w.astype(jnp.float32), axis=-1).astype(w.dtype)
    a = jnp.einsum('bts,bcs->bct', w, v)
    return a.reshape(bs, -1, length)


def _check(out, ref, tag):
    err = float(jnp.max(jnp.abs(out - ref)))
    assert jnp.allclose(out, ref, atol=5e-3, rtol=5e-3), (tag, err)


if __name__ == "__main__":
    # 1) Small shape consistent with the module: bs=2, n_heads=2, ch=8, L=16.
    bs, n_heads, ch, length = 2, 2, 8, 16
    qkv = jax.random.normal(jax.random.PRNGKey(0),
                            (bs, 3 * n_heads * ch, length), dtype=jnp.float32)
    out = jax.block_until_ready(qkv_attention_legacy(qkv, n_heads))
    assert out.shape == (bs, n_heads * ch, length)
    _check(out, _reference(qkv, n_heads), "tiny")

    # 2) Forced small tiles -> exercises the multi-step online-softmax path
    #    (grid = (2, 4, 4)).
    qkv2 = jax.random.normal(jax.random.PRNGKey(1),
                             (1, 3 * 2 * 16, 512), dtype=jnp.float32)
    ref2 = _reference(qkv2, 2)
    out2 = jax.block_until_ready(qkv_attention_legacy(qkv2, 2, tq=128, tkv=128))
    _check(out2, ref2, "tiled")

    # 3) Default tiling on the same input: resident K/V, kv grid axis == 1.
    out3 = jax.block_until_ready(qkv_attention_legacy(qkv2, 2))
    _check(out3, ref2, "resident-kv")

    # 4) Length not a multiple of 128 (> 512) and ch not a multiple of 8:
    #    padded + in-kernel key masking, multiple kv steps, odd head dim.
    qkv4 = jax.random.normal(jax.random.PRNGKey(2),
                             (1, 3 * 1 * 20, 700), dtype=jnp.float32)
    out4 = jax.block_until_ready(qkv_attention_legacy(qkv4, 1, tkv=256))
    _check(out4, _reference(qkv4, 1), "masked")

    print("KERNEL_OK")
</pallas_src>

<mosaic_0001>
module attributes {stable_mosaic.version = 11 : i64} {
  func.func @_flash_attn_kernel(%arg0: i32, %arg1: i32, %arg2: i32, %arg3: memref<1x1x8x16xf32, #tpu.memory_space<vmem>>, %arg4: memref<1x1x8x16xf32, #tpu.memory_space<vmem>>, %arg5: memref<1x1x8x16xf32, #tpu.memory_space<vmem>>, %arg6: memref<1x8x16xf32, #tpu.memory_space<vmem>>, %arg7: memref<1x16xf32, #tpu.memory_space<vmem>>, %arg8: memref<1x16xf32, #tpu.memory_space<vmem>>, %arg9: memref<8x16xf32, #tpu.memory_space<vmem>>) attributes {dimension_semantics = [#tpu.dimension_semantics<parallel>, #tpu.dimension_semantics<parallel>, #tpu.dimension_semantics<arbitrary>], iteration_bounds = array<i64: 4, 1, 1>, scalar_prefetch = 0 : i64, scratch_operands = 3 : i64, tpu.core_type = #tpu.core_type<tc>, window_params = [{transform_indices = @transform_0, window_bounds = array<i64: 1, 1, 8, 16>}, {transform_indices = @transform_1, window_bounds = array<i64: 1, 1, 8, 16>}, {transform_indices = @transform_2, window_bounds = array<i64: 1, 1, 8, 16>}, {transform_indices = @transform_3, window_bounds = array<i64: 1, 8, 16>}]} {
    %c0_i32 = arith.constant 0 : i32
    %0 = arith.cmpi eq, %arg2, %c0_i32 : i32
    %1 = arith.extui %0 : i1 to i32
    %c0_i32_0 = arith.constant 0 : i32
    %2 = arith.cmpi ne, %1, %c0_i32_0 : i32
    scf.if %2 {
      %cst_31 = arith.constant -1.000000e+30 : f32
      %39 = vector.broadcast %cst_31 : f32 to vector<1x16xf32>
      %c0_32 = arith.constant 0 : index
      %c0_33 = arith.constant 0 : index
      %40 = vector.load %arg7[%c0_32, %c0_33] : memref<1x16xf32, #tpu.memory_space<vmem>>, vector<1x16xf32>
      tpu.vector_store %arg7[%c0_32, %c0_33], %39 {strides = array<i32>} : memref<1x16xf32, #tpu.memory_space<vmem>>, vector<1x16xf32>,
      %cst_34 = arith.constant 0.000000e+00 : f32
      %41 = vector.broadcast %cst_34 : f32 to vector<1x16xf32>
      %c0_35 = arith.constant 0 : index
      %c0_36 = arith.constant 0 : index
      %42 = vector.load %arg8[%c0_35, %c0_36] : memref<1x16xf32, #tpu.memory_space<vmem>>, vector<1x16xf32>
      tpu.vector_store %arg8[%c0_35, %c0_36], %41 {strides = array<i32>} : memref<1x16xf32, #tpu.memory_space<vmem>>, vector<1x16xf32>,
      %cst_37 = arith.constant 0.000000e+00 : f32
      %43 = vector.broadcast %cst_37 : f32 to vector<8x16xf32>
      %c0_38 = arith.constant 0 : index
      %c0_39 = arith.constant 0 : index
      %44 = vector.load %arg9[%c0_38, %c0_39] : memref<8x16xf32, #tpu.memory_space<vmem>>, vector<8x16xf32>
      tpu.vector_store %arg9[%c0_38, %c0_39], %43 {strides = array<i32>} : memref<8x16xf32, #tpu.memory_space<vmem>>, vector<8x16xf32>,
    } else {
    }
    %c0 = arith.constant 0 : index
    %c0_1 = arith.constant 0 : index
    %c0_2 = arith.constant 0 : index
    %c0_3 = arith.constant 0 : index
    %3 = vector.load %arg3[%c0, %c0_1, %c0_2, %c0_3] : memref<1x1x8x16xf32, #tpu.memory_space<vmem>>, vector<1x1x8x16xf32>
    %4 = vector.shape_cast %3 : vector<1x1x8x16xf32> to vector<8x16xf32>
    %c0_4 = arith.constant 0 : index
    %c0_5 = arith.constant 0 : index
    %c0_6 = arith.constant 0 : index
    %c0_7 = arith.constant 0 : index
    %5 = vector.load %arg4[%c0_4, %c0_5, %c0_6, %c0_7] : memref<1x1x8x16xf32, #tpu.memory_space<vmem>>, vector<1x1x8x16xf32>
    %6 = vector.shape_cast %5 : vector<1x1x8x16xf32> to vector<8x16xf32>
    %c0_8 = arith.constant 0 : index
    %c0_9 = arith.constant 0 : index
    %c0_10 = arith.constant 0 : index
    %c0_11 = arith.constant 0 : index
    %7 = vector.load %arg5[%c0_8, %c0_9, %c0_10, %c0_11] : memref<1x1x8x16xf32, #tpu.memory_space<vmem>>, vector<1x1x8x16xf32>
    %8 = vector.shape_cast %7 : vector<1x1x8x16xf32> to vector<8x16xf32>
    %cst = arith.constant dense<0.000000e+00> : vector<16x16xf32>
    %9 = tpu.matmul %6, %4, %cst {dimension_numbers = #tpu.dot_dimension_numbers<[0], [0], [1], [1], [0, 1, 1, 1], [], []>} : vector<8x16xf32>, vector<8x16xf32>, vector<16x16xf32> -> vector<16x16xf32>
    %c0_12 = arith.constant 0 : index
    %c0_13 = arith.constant 0 : index
    %10 = vector.load %arg7[%c0_12, %c0_13] : memref<1x16xf32, #tpu.memory_space<vmem>>, vector<1x16xf32>
    %cst_14 = arith.constant dense<0xFF800000> : vector<16xf32>
    %11 = vector.multi_reduction <maximumf>, %9, %cst_14 [0] : vector<16x16xf32> to vector<16xf32>
    %12 = vector.shape_cast %11 : vector<16xf32> to vector<1x16xf32>
    %13 = arith.maximumf %10, %12 : vector<1x16xf32>
    %14 = arith.subf %10, %13 : vector<1x16xf32>
    %cst_15 = arith.constant 0.510069728 : f32
    %15 = vector.broadcast %cst_15 : f32 to vector<1x16xf32>
    %16 = arith.mulf %14, %15 : vector<1x16xf32>
    %17 = math.exp2 %16 : vector<1x16xf32>
    %18 = vector.broadcast %13 : vector<1x16xf32> to vector<16x16xf32>
    %19 = arith.subf %9, %18 : vector<16x16xf32>
    %cst_16 = arith.constant 0.510069728 : f32
    %20 = vector.broadcast %cst_16 : f32 to vector<16x16xf32>
    %21 = arith.mulf %19, %20 : vector<16x16xf32>
    %22 = math.exp2 %21 : vector<16x16xf32>
    %c0_17 = arith.constant 0 : index
    %c0_18 = arith.constant 0 : index
    %23 = vector.load %arg8[%c0_17, %c0_18] : memref<1x16xf32, #tpu.memory_space<vmem>>, vector<1x16xf32>
    %24 = arith.mulf %17, %23 : vector<1x16xf32>
    %cst_19 = arith.constant dense<0.000000e+00> : vector<16xf32>
    %25 = vector.multi_reduction <add>, %22, %cst_19 [0] : vector<16x16xf32> to vector<16xf32>
    %26 = vector.shape_cast %25 : vector<16xf32> to vector<1x16xf32>
    %27 = arith.addf %24, %26 : vector<1x16xf32>
    %c0_20 = arith.constant 0 : index
    %c0_21 = arith.constant 0 : index
    %28 = vector.load %arg8[%c0_20, %c0_21] : memref<1x16xf32, #tpu.memory_space<vmem>>, vector<1x16xf32>
    tpu.vector_store %arg8[%c0_20, %c0_21], %27 {strides = array<i32>} : memref<1x16xf32, #tpu.memory_space<vmem>>, vector<1x16xf32>,
    %cst_22 = arith.constant dense<0.000000e+00> : vector<8x16xf32>
    %29 = tpu.matmul %8, %22, %cst_22 {dimension_numbers = #tpu.dot_dimension_numbers<[1], [0], [0], [1], [0, 0, 1, 1], [], []>} : vector<8x16xf32>, vector<16x16xf32>, vector<8x16xf32> -> vector<8x16xf32>
    %c0_23 = arith.constant 0 : index
    %c0_24 = arith.constant 0 : index
    %30 = vector.load %arg9[%c0_23, %c0_24] : memref<8x16xf32, #tpu.memory_space<vmem>>, vector<8x16xf32>
    %31 = vector.broadcast %17 : vector<1x16xf32> to vector<8x16xf32>
    %32 = arith.mulf %31, %30 : vector<8x16xf32>
    %33 = arith.addf %32, %29 : vector<8x16xf32>
    %c0_25 = arith.constant 0 : index
    %c0_26 = arith.constant 0 : index
    %34 = vector.load %arg9[%c0_25, %c0_26] : memref<8x16xf32, #tpu.memory_space<vmem>>, vector<8x16xf32>
    tpu.vector_store %arg9[%c0_25, %c0_26], %33 {strides = array<i32>} : memref<8x16xf32, #tpu.memory_space<vmem>>, vector<8x16xf32>,
    %c0_27 = arith.constant 0 : index
    %c0_28 = arith.constant 0 : index
    %35 = vector.load %arg7[%c0_27, %c0_28] : memref<1x16xf32, #tpu.memory_space<vmem>>, vector<1x16xf32>
    tpu.vector_store %arg7[%c0_27, %c0_28], %13 {strides = array<i32>} : memref<1x16xf32, #tpu.memory_space<vmem>>, vector<1x16xf32>,
    %c0_i32_29 = arith.constant 0 : i32
    %36 = arith.cmpi eq, %arg2, %c0_i32_29 : i32
    %37 = arith.extui %36 : i1 to i32
    %c0_i32_30 = arith.constant 0 : i32
    %38 = arith.cmpi ne, %37, %c0_i32_30 : i32
    scf.if %38 {
      %c0_31 = arith.constant 0 : index
      %c0_32 = arith.constant 0 : index
      %39 = vector.load %arg8[%c0_31, %c0_32] : memref<1x16xf32, #tpu.memory_space<vmem>>, vector<1x16xf32>
      %40 = tpu.reciprocal %39 {approx = true} : vector<1x16xf32> -> vector<1x16xf32>
      %c0_33 = arith.constant 0 : index
      %c0_34 = arith.constant 0 : index
      %41 = vector.load %arg9[%c0_33, %c0_34] : memref<8x16xf32, #tpu.memory_space<vmem>>, vector<8x16xf32>
      %42 = vector.broadcast %40 : vector<1x16xf32> to vector<8x16xf32>
      %43 = arith.mulf %41, %42 : vector<8x16xf32>
      %c0_35 = arith.constant 0 : index
      %c0_36 = arith.constant 0 : index
      %c0_37 = arith.constant 0 : index
      %44 = vector.load %arg6[%c0_35, %c0_36, %c0_37] : memref<1x8x16xf32, #tpu.memory_space<vmem>>, vector<1x8x16xf32>
      %45 = vector.shape_cast %44 : vector<1x8x16xf32> to vector<8x16xf32>
      %46 = vector.shape_cast %43 : vector<8x16xf32> to vector<1x8x16xf32>
      tpu.vector_store %arg6[%c0_35, %c0_36, %c0_37], %46 {strides = array<i32>} : memref<1x8x16xf32, #tpu.memory_space<vmem>>, vector<1x8x16xf32>,
    } else {
    }
    return
  }
  func.func @transform_0(%arg0: i32, %arg1: i32, %arg2: i32) -> (i32, i32, i32, i32) {
    %c0_i32 = arith.constant 0 : i32
    %c0_i32_0 = arith.constant 0 : i32
    %c0_i32_1 = arith.constant 0 : i32
    return %arg0, %c0_i32, %c0_i32_0, %arg1 : i32, i32, i32, i32
  }
  func.func @transform_1(%arg0: i32, %arg1: i32, %arg2: i32) -> (i32, i32, i32, i32) {
    %c1_i32 = arith.constant 1 : i32
    %c0_i32 = arith.constant 0 : i32
    %c0_i32_0 = arith.constant 0 : i32
    return %arg0, %c1_i32, %c0_i32, %arg2 : i32, i32, i32, i32
  }
  func.func @transform_2(%arg0: i32, %arg1: i32, %arg2: i32) -> (i32, i32, i32, i32) {
    %c2_i32 = arith.constant 2 : i32
    %c0_i32 = arith.constant 0 : i32
    %c0_i32_0 = arith.constant 0 : i32
    return %arg0, %c2_i32, %c0_i32, %arg2 : i32, i32, i32, i32
  }
  func.func @transform_3(%arg0: i32, %arg1: i32, %arg2: i32) -> (i32, i32, i32) {
    %c0_i32 = arith.constant 0 : i32
    %c0_i32_0 = arith.constant 0 : i32
    return %arg0, %c0_i32, %arg1 : i32, i32, i32
  }
}

</mosaic_0001>

<bundles_post_ra>
// kernel: tpu_custom_call.1
= control target key start
LH: loop header
LB: loop body
LE: loop exit
PB: predicated region body
PF: predicated region fallthrough
CT: control target
= control target key end

     0   :  { %s1076_s0 = inlined_call_operand.hbm [shape: f32[4,3,8,16], index: 0, kind: input, shape index: {}]   ;;  %s1077_s1 = inlined_call_operand.hbm [shape: f32[4,3,8,16], index: 1, kind: input, shape index: {}]   ;;  %s1078_s2 = inlined_call_operand.hbm [shape: f32[4,3,8,16], index: 2, kind: input, shape index: {}]   ;;  %s1079_s3 = inlined_call_operand.hbm [shape: f32[4,8,16], index: 3, kind: output, shape index: {}]  }
   0x1   :  { %1083 = sst [smem:[#allocation19_spill]] %s1077_s1 }
   0x2   :  { %8 = vsyncpa [#allocation6], 0 }
   0x3   :  { %10 = vsyncpa [#allocation6 + $0x1], 0 }
   0x4   :  { %11 = vsyncpa [#allocation9], 0 }
   0x5   :  { %13 = vsyncpa [#allocation9 + $0x1], 0 }
   0x6   :  { %14 = vsyncpa [#allocation7], 0 }
   0x7   :  { %16 = vsyncpa [#allocation7 + $0x1], 0  ;;  %s908_s12 = smov 0   ;;  %s910_s13 = smov 0  }
   0x8   :  { %s912_s14 = smov 0   ;;  %s914_s15 = smov 0  }
   0x9   :  { %s916_s16 = smov 0   ;;  %s918_s17 = smov 0  }
   0xa LB: > { %1084 = sst [smem:[#allocation15_spill]] %s872_s14  ;;  %s939_s18 = sadd.s32 4294967295, %s884_s17   ;;  %s884_s17 = sphi %s918_s17, %s22_s17   ;;  %s880_s16 = sphi %s916_s16, %s1098_s16   ;;  %s876_s15 = sphi %s914_s15, %s1097_s15   ;;  %s872_s14 = sphi %s912_s14, %s1096_s14   ;;  %s868_s13 = sphi %s910_s13, %s1100_s13   ;;  %s864_s12 = sphi %s908_s12, %s1099_s12  }
   0xb   : > { %1085 = sst [smem:[#allocation16_spill]] %s880_s16  ;;  %s603_s19 = sadd.s32 4294967294, %s884_s17  }
   0xc   : > { %s41_s20 = sadd.s32 1, %s880_s16  ;;  %s50_s21 = sadd.s32 1, %s872_s14 }
   0xd   : > { %p43_p0 = scmp.ge.s32.totalorder %s41_s20, 4  ;;  %p57_p1 = scmp.ne.s32.totalorder %s872_s14, %s868_s13 }
   0xe   : > { %p58_p2 = scmp.eq.s32.totalorder %s884_s17, 0  ;;  %p63_p3 = scmp.ne.s32.totalorder %s868_s13, %s864_s12 }
   0xf   : > { %s1102_s20 = smov (%p43_p0, %s41_s20), 0  ;;  %p64_p5 = scmp.eq.s32.totalorder %s939_s18, 0 }
  0x10   : > { %1086 = sst [smem:[#allocation17_spill]] %s1102_s20  ;;  %p951_p4 = por %p58_p2, %p57_p1 }
  0x11   : > { %s45_s23 = ssub.s32 %s880_s16, %s1102_s20  ;;  %p145_p6 = scmp.eq.s32.totalorder %s939_s18, 3 }
  0x12   : > { %p48_p7 = scmp.eq.s32.totalorder %s45_s23, 0  ;;  %p959_p8 = por %p64_p5, %p63_p3 }
  0x13   : > { %p963_p9 = por %p145_p6, %p57_p1  ;;  %p151_p10 = scmp.eq.s32.totalorder %s603_s19, 3 }
  0x14   : > { %s968_s26 = scalar_select %p48_p7, %s872_s14, %s50_s21  }
  0x15   : > { %p970_p11 = por %p151_p10, %p63_p3  ;;  %p648_p12 = scmp.lt.s32.totalorder %s884_s17, 4 }
  0x16   : > { %1090 = sst [smem:[#allocation18_spill]] %s968_s26  ;;  %s171_s28 = sand.u32 1, %s872_s14  }
  0x17   : > { %s606_s29 = sshll.u32 %s171_s28, 3  ;;  %s625_s30 = smul.u32 24, %s880_s16 }
  0x18   : > { %p979_p13 = pnand %p648_p12, %p951_p4  ;;  %s192_s5 = sand.u32 1, %s884_s17  }
  0x19   : > { %s1093_s1 = sld [smem:[#allocation19_spill]]  ;;  %s196_s10 = scalar_lea.vmem [#allocation8], %s606_s29 }
  0x1a   : > { %s207_s11 = sshll.u32 %s196_s10, 4  ;;  %p612_p0 = scmp.ge.s32.totalorder %s884_s17, 1  ;;  %s208_s11 = int_to_ptr.vmem [resolvable:$true] %s207_s11 }
  0x1b   : > { %s193_s21 = scalar_lea.sflag [#allocation9], %s192_s5  ;;  %p234_p1 = scmp.lt.s32.totalorder %s884_s17, 5 }
  0x1c   : > { %s181_s6 = scalar_lea.hbm %s1076_s0, %s625_s30  ;;  %s175_s7 = scalar_lea.vmem [#allocation5], %s606_s29 }
  0x1d   : > { %p991_p2 = pnand %p612_p0, %p234_p1  ;;  %s183_s10 = sshll.u32 %s181_s6, 4  ;;  %s184_s10 = int_to_ptr.hbm [resolvable:$true] %s183_s10 }
  0x1e   : > { %s1008_s20 = sand.u32 (!%p991_p2), 1, %s868_s13  }
  0x1f   : > { %s509_s8 = scalar_lea.hbm %s1093_s1, %s625_s30  ;;  %s218_s1 = scalar_lea.vmem [#allocation10], %s606_s29 }
  0x20   : > { %s510_s9 = scalar_lea.hbm %s509_s8, 8  ;;  %s185_s8 = sshll.u32 %s175_s7, 4  ;;  %s186_s8 = int_to_ptr.vmem [resolvable:$true] %s185_s8 }
  0x21   : > { %s205_s19 = sshll.u32 %s510_s9, 4  ;;  %s172_s9 = scalar_lea.sflag [#allocation6], %s171_s28  ;;  %s206_s19 = int_to_ptr.hbm [resolvable:$true] %s205_s19 }
  0x22   : > { %640 = dma.hbm_to_vmem [thread:$0]  (!%p979_p13), %s206_s19, 128, %s208_s11, %s193_s21  }
  0x23   : > { %637 = dma.hbm_to_vmem [thread:$0]  (!%p979_p13), %s184_s10, 128, %s186_s8, %s172_s9  }
  0x24   : > { %s517_s19 = scalar_lea.hbm %s1078_s2, %s625_s30  ;;  %s229_s16 = sshll.u32 %s218_s1, 4  ;;  %s230_s16 = int_to_ptr.vmem [resolvable:$true] %s229_s16 }
  0x25   : > { %s518_s26 = scalar_lea.hbm %s517_s19, 16  ;;  %238 = sbr.rel (%p991_p2) target bundleno = 527 (0x20f), region = 32 }
  0x26   : > { %s227_s14 = sshll.u32 %s518_s26, 4  ;;  %s1011_s28 = sshll.u32 (!%p991_p2), %s1008_s20, 3  ;;  %s228_s14 = int_to_ptr.hbm [resolvable:$true] %s227_s14 }
  0x27   : > { %643 = dma.hbm_to_vmem [thread:$0]  (!%p979_p13), %s228_s14, 128, %s230_s16, %s193_s21  }
  0x28   : > { %s241_s29 = scalar_lea.sflag (!%p991_p2), [#allocation6], %s1008_s20  ;;  %s244_s1 = scalar_lea.vmem (!%p991_p2), [#allocation5], %s1011_s28 }
  0x2a   : > { %851 = dma.done.wait (%p959_p8), %s241_s29, 128  }
  0x2b   : > { %853 = vsyncadd (%p959_p8), %s241_s29, 4294967168  ;;  %s250_s14 = sand.u32 1, %s939_s18   ;;  %s254_s26 = scalar_lea.vmem [#allocation8], %s1011_s28 }
  0x2c   : > { %s251_s16 = scalar_lea.sflag [#allocation9], %s250_s14 }
  0x2d   : > { %855 = dma.done.wait (%p959_p8), %s251_s16, 256  }
  0x2e   : > { %857 = vsyncadd (%p959_p8), %s251_s16, 4294967040  ;;  %v308_v0 = vld [vmem:[%s254_s26] sm:$0xff]  ;;  %v307_v1 = vld [vmem:[%s244_s1] sm:$0xff]  ;;  %vm342_vm0 = vcmask 64512   ;;  %vm302_vm1 = vcmask 122880   ;;  %vm305_vm2 = vcmask 130048  }
  0x2f   : > { %310 = vxpose.xlu0.b32.start.end [1/1] (short) (narrow) %v308_v0, 16  ;;  %364 = vmatpush.msra.mxu0 %v307_v1  ;;  %v886_v4 = vmov -1e+30   ;;  %v887_v5 = vmov 0.0   ;;  %s264_s18 = scalar_lea.vmem [#allocation10], %s1011_s28  ;;  %s621_s24 = sshll.u32 %s876_s15, 3 }
  0x30   : > { %624 = vmatpush.msra.mxu2 %v307_v1  ;;  %303 = vst.msk [vmem:[#allocation2] sm:$0x1] %vm302_vm1, %v886_v4  ;;  %v309_v29 = vld [vmem:[%s264_s18] sm:$0xff]  ;;  %s464_s21 = scalar_lea.hbm %s1079_s3, %s621_s24  ;;  %s297_s22 = scalar_lea.vmem [#allocation11], %s1011_s28 }
  0x31   : > { %304 = vst.msk [vmem:[#allocation3] sm:$0x1] %vm302_vm1, %v887_v5  ;;  %s466_s23 = sshll.u32 %s297_s22, 4  ;;  %s468_s6 = sshll.u32 %s464_s21, 4  ;;  %s467_s23 = int_to_ptr.vmem [resolvable:$true] %s466_s23  ;;  %s469_s6 = int_to_ptr.hbm [resolvable:$true] %s468_s6 }
  0x32   : > { %306 = vst.msk [vmem:[#allocation4] sm:$0xff] %vm305_vm2, %v887_v5  ;;  %s453_s7 = scalar_lea.sflag [#allocation7], %s1008_s20  ;;  %s812_s15 = sshra.s32 %s469_s6, 4  ;;  %s813_s15 = int_to_ptr.hbm [resolvable:$true] %s812_s15 }
  0x33   : > { %s814_s8 = scalar_lea.hbm %s813_s15, 8  ;;  %s818_s5 = scalar_lea.hbm %s1079_s3, 32 }
  0x34   : > { %p815_p3 = scmp.ne.s32.totalorder %s813_s15, %s814_s8  ;;  %p819_p6 = scmp.lt.s32.totalorder %s813_s15, %s1079_s3 }
  0x35   : > { %p820_p7 = scmp.lt.s32.totalorder %s818_s5, %s814_s8 }
  0x36   : > { %p816_p4 = pnand %p815_p3, %p963_p9 }
  0x37   : > { %v372_v16 = vld [vmem:[#allocation2] sm:$0x1]  ;;  %p821_p8 = por %p820_p7, %p819_p6 }
  0x38   : > { %v396_v37 = vld [vmem:[#allocation3] sm:$0x1]  ;;  %p817_p5 = pneg %p816_p4 }
  0x39   : > { %v433_v43 = vld [vmem:[#allocation4] sm:$0xff] }
  0x3a   : > { %p822_p10 = pnand %p821_p8, %p817_p5 }
  0xd3   : > { %v326_v2 = vpop.trf.xlu0 }
  0xd4   : > { %617 = vmatmul.msk.f32.vlgmr.msra.gmra.mxu0 %vm342_vm0, %v326_v2 }
  0xdb   : > { %v327_v3 = vpop.trf.xlu0 }
  0xdc   : > { %618 = vmatmul.msk.f32.vlgmr.msra.gmra.mxu2 %vm342_vm0, %v327_v3 }
 0x151   : > { %v366_v6 = vpop.f32.mrf.mxu0 }
 0x152   : > { %v374_v8 = vsel %vm305_vm2, %v366_v6, -inf }
 0x15f   : > { %v369_v7 = vpop.f32.mrf.mxu2 }
 0x160   : > { %v375_v9 = vsel %vm305_vm2, %v369_v7, -inf }
 0x161   : > { %v376_v10 = vmax.f32 %v374_v8, %v375_v9 }
 0x163   : > { %v377_v11 = vrot.slane %v376_v10, 4 }
 0x165   : > { %v378_v12 = vmax.f32 %v376_v10, %v377_v11 }
 0x167   : > { %v379_v13 = vrot.slane %v378_v12, 2 }
 0x169   : > { %v380_v14 = vmax.f32 %v378_v12, %v379_v13 }
 0x16b   : > { %v381_v15 = vrot.slane %v380_v14, 1 }
 0x16d   : > { %v382_v17 = vmax.f32 %v380_v14, %v381_v15 }
 0x16f   : > { %v383_v18 = vmax.f32 %v372_v16, %v382_v17 }
 0x171   : > { %v388_v19 = vperm.slane %v383_v18, 0  ;;  %440 = vst.msk [vmem:[#allocation2] sm:$0x1] %vm302_vm1, %v383_v18  ;;  %v384_v24 = vsub.f32 %v372_v16, %v383_v18 }
 0x173   : > { %v390_v20 = vsub.f32 %v366_v6, %v388_v19  ;;  %v391_v21 = vsub.f32 %v369_v7, %v388_v19  ;;  %v385_v30 = vmul.f32 0.5100697, %v384_v24 }
 0x175   : > { %v392_v22 = vmul.f32 0.5100697, %v390_v20  ;;  %v393_v23 = vmul.f32 0.5100697, %v391_v21 }
 0x177   : > { %700 = vpow2.f32 %v392_v22 }
 0x178   : > { %702 = vpow2.f32 %v393_v23 }
 0x179   : > { %704 = vpow2.f32 %v385_v30 }
 0x17d   : > { %v701_v25 = vpop.eup %700 }
 0x17e   : > { %v703_v26 = vpop.eup %702  ;;  %v398_v27 = vsel %vm305_vm2, %v701_v25, 0.0 }
 0x17f   : > { %v399_v28 = vsel %vm305_vm2, %v703_v26, 0.0  ;;  %427 = vmatpush.msra.mxu1 %v703_v26  ;;  %v705_v36 = vpop.eup %704 }
 0x180   : > { %v400_v31 = vadd.f32 %v399_v28, %v398_v27  ;;  %v397_v40 = vmul.f32 %v705_v36, %v396_v37  ;;  %v435_v42 = vperm.slane %v705_v36, 0 }
 0x181   : > { %428 = vmatpush.msra.mxu1 %v701_v25 }
 0x182   : > { %v401_v32 = vrot.slane %v400_v31, 4  ;;  %619 = vmatmul.msk.f32.vlgmr.msra.gmra.mxu1 %vm305_vm2, %v309_v29  ;;  %v437_v45 = vmul.f32 %v435_v42, %v433_v43 }
 0x184   : > { %v402_v33 = vadd.f32 %v401_v32, %v400_v31 }
 0x186   : > { %v403_v34 = vrot.slane %v402_v33, 2 }
 0x188   : > { %v404_v35 = vadd.f32 %v403_v34, %v402_v33 }
 0x18a   : > { %v405_v38 = vrot.slane %v404_v35, 1 }
 0x18c   : > { %v406_v39 = vadd.f32 %v405_v38, %v404_v35 }
 0x18e   : > { %v407_v41 = vadd.f32 %v406_v39, %v397_v40 }
 0x190   : > { %409 = vst.msk [vmem:[#allocation3] sm:$0x1] %vm302_vm1, %v407_v41 }
 0x197   : > { %v444_v44 = vld [vmem:[#allocation3] sm:$0x1] }
 0x198   : > { %706 = vrcp.f32 %v444_v44 }
 0x19e   : > { %v707_v48 = vpop.eup %706 }
 0x19f   : > { %v448_v49 = vperm.slane %v707_v48, 0 }
 0x1ff   : > { %v430_v46 = vpop.f32.mrf.mxu1 }
 0x200   : > { %v438_v47 = vadd.f32 %v437_v45, %v430_v46 }
 0x202   : > { %439 = vst.msk [vmem:[#allocation4] sm:$0xff] %vm305_vm2, %v438_v47 }
 0x209   : > { %v446_v50 = vld [vmem:[#allocation4] sm:$0xff] }
 0x20a   : > { %v450_v51 = vmul.f32 %v448_v49, %v446_v50 }
 0x20c   : > { %451 = vst.msk [vmem:[%s297_s22] sm:$0xff] %vm305_vm2, %v450_v51 }
 0x20d   : > { %825 = shalt.err (!%p822_p10)
}
 0x20e   : > { %632 = dma.vmem_to_hbm [thread:$0]  (%p963_p9), %s467_s23, 128, %s469_s6, %s453_s7  }
 0x20f PF: > { %p649_p12 = scmp.ge.s32.totalorder %s884_s17, 2  ;;  %s480_s20 = sand.u32 1, %s864_s12  }
 0x210   : > { %s481_s28 = scalar_lea.sflag [#allocation7], %s480_s20 }
 0x211   : > { %p645_p13 = pnand %p649_p12, %p970_p11 }
 0x213   : > { %p646_p0 = pneg %p645_p13 }
 0x215   : > { %859 = dma.done.wait (%p646_p0), %s481_s28, 128  }
 0x216   : > { %861 = vsyncadd (%p646_p0), %s481_s28, 4294967168  ;;  %s22_s17 = sadd.s32 1, %s884_s17   ;;  %s1095_s29 = sld [smem:[#allocation15_spill]] }
 0x217   : > { %p19_p1 = scmp.ge.s32.totalorder %s22_s17, 6   ;;  %s1096_s14 = sld [smem:[#allocation18_spill]] }
 0x218   : > { %s1097_s15 = sld [smem:[#allocation16_spill]]  ;;  %s1099_s12 = smov %s868_s13 }
 0x219   : > { %s1098_s16 = sld [smem:[#allocation17_spill]]  ;;  %21 = sbr.rel (!%p19_p1) target bundleno = 10 (0xa), region = 109 }
 0x21c   : > { %s1100_s13 = smov %s1095_s29 }
 0x21e   :  { %487 = vsyncpa [#allocation6], 1 }
 0x21f   :  { %489 = vsyncpa [#allocation6 + $0x1], 1 }
 0x220   :  { %490 = vsyncpa [#allocation9], 1 }
 0x221   :  { %492 = vsyncpa [#allocation9 + $0x1], 1 }
 0x222   :  { %493 = vsyncpa [#allocation7], 1 }
 0x223   :  { %495 = vsyncpa [#allocation7 + $0x1], 1 }

</bundles_post_ra>
